<compile_context>
chip_gen: v7x
topology: tpu7x:2x2x1
jax: 0.10.0
libtpu: 0.0.40
codegen_flags: <defaults>
</compile_context>

<pallas_src>
import jax
import jax.numpy as jnp
from jax.experimental import pallas as pl
from jax.experimental.pallas import tpu as pltpu

INPUT_DIM = 32     # input_dim (per-head embedding size)
NUM_HEADS = 4
NEG_BIG = -1.0e30  # finite stand-in for -inf in masked_fill


# ---------------- Pallas kernel ----------------
def _mha_kernel(x_ref, bias_ref, w_ref, b_ref, out_ref):
    """One grid step: TILE_B batch elements, tokens flattened to (TILE_B*S, D).

    w_ref fuses the value projection and the lane-expanded, query-folded score
    projection into a single (D, 2*H*D) matrix, so the whole step is one MXU
    matmul, one EUP exp, and a few sublane-axis reductions.
    """
    tile_b, hd = out_ref.shape            # hd = H*D (128 for this module)
    m = x_ref.shape[0]                    # m = tile_b * s_pad
    s = m // tile_b                       # padded sequence length (multiple of 8)

    # single fused projection: columns [0, hd) = values, [hd, 2*hd) = scores
    proj = jnp.dot(x_ref[...], w_ref[...],
                   preferred_element_type=jnp.float32) + b_ref[...]        # (M, 2*HD)
    v = proj[:, :hd]                                                       # (M, HD)
    scores = proj[:, hd:] + bias_ref[...]     # additive mask bias (0 / -1e30)

    # free re-tiling of the sublane axis: (M, HD) -> (TILE_B, S, HD), S % 8 == 0
    v3 = v.reshape(tile_b, s, hd)
    s3 = scores.reshape(tile_b, s, hd)

    # softmax over the sequence, stabilized per batch element (sublane reduce)
    mx = jnp.max(s3, axis=1, keepdims=True)                                # (TILE_B, 1, HD)
    p = jnp.exp(s3 - mx)                                                   # (TILE_B, S, HD)
    num = jnp.sum(p * v3, axis=1)                                          # (TILE_B, HD)
    den = jnp.sum(p, axis=1)                                               # (TILE_B, HD)

    # fully-masked rows give a uniform average of values (torch would give NaN)
    out_ref[...] = (num / (den + 1e-30)).astype(out_ref.dtype)


# ---------------- wrapper ----------------
def multihead_attention_forward(x, non_padded_mask, params, *, tile_b=None):
    """x: (B, S, D) f32, non_padded_mask: (B, S) bool.  Returns (B, D)."""
    x = x.astype(jnp.float32)
    B, S, D = x.shape
    H = params["q"].shape[0]
    HD = H * D

    # ---- fold the learned queries into the key projection (wrapper-side) ----
    wq_eff = jnp.einsum("dhe,he->dh", params["wk"].reshape(D, H, D), params["q"])  # (D, H)
    bq_eff = jnp.einsum("he,he->h", params["bk"].reshape(H, D), params["q"])       # (H,)

    # lane-expand the per-head scores across each head's D lanes, then fuse the
    # value projection and the expanded score projection into one matmul.
    head_exp = jnp.kron(jnp.eye(H, dtype=jnp.float32),
                        jnp.ones((1, D), jnp.float32))                             # (H, HD)
    wq_exp = wq_eff @ head_exp                                                     # (D, HD)
    bq_exp = bq_eff[None, :] @ head_exp                                            # (1, HD)
    w_fused = jnp.concatenate([params["wv"], wq_exp], axis=1)                      # (D, 2*HD)
    b_fused = jnp.concatenate([params["bv"][None, :], bq_exp], axis=1)             # (1, 2*HD)

    # ---- tile-size selection (tuning knob) ----
    if tile_b is None:
        tile_b = 64                               # m_rows ~ 512 at S=8
        b_ceil8 = ((B + 7) // 8) * 8
        if b_ceil8 < 2 * tile_b:                  # small batch: 2 balanced steps (v7x 2 TCs)
            tile_b = max(8, (((b_ceil8 + 1) // 2) + 7) // 8 * 8)
    tile_b = max(8, ((tile_b + 7) // 8) * 8)

    # ---- pad sequence to a multiple of 8 (free sublane sums) and batch to tile_b ----
    s_pad = ((S + 7) // 8) * 8
    b_pad = ((B + tile_b - 1) // tile_b) * tile_b
    x_p = jnp.pad(x, ((0, b_pad - B), (0, s_pad - S), (0, 0)))
    mask_p = jnp.pad(non_padded_mask, ((0, b_pad - B), (0, s_pad - S)))  # padding is masked out
    bias_p = jnp.where(mask_p, 0.0, NEG_BIG).astype(jnp.float32)

    x_flat = x_p.reshape(b_pad * s_pad, D)
    bias_flat = bias_p.reshape(b_pad * s_pad, 1)
    m_rows = tile_b * s_pad

    def rep_spec(a):
        nd = a.ndim
        return pl.BlockSpec(a.shape, lambda i, nd=nd: (0,) * nd)

    agg = pl.pallas_call(
        _mha_kernel,
        out_shape=jax.ShapeDtypeStruct((b_pad, HD), jnp.float32),
        grid_spec=pltpu.PrefetchScalarGridSpec(
            num_scalar_prefetch=0,
            grid=(b_pad // tile_b,),
            in_specs=[
                pl.BlockSpec((m_rows, D), lambda i: (i, 0)),   # flattened tokens
                pl.BlockSpec((m_rows, 1), lambda i: (i, 0)),   # additive mask bias
                rep_spec(w_fused),                             # fused projection weight
                rep_spec(b_fused),                             # fused projection bias
            ],
            out_specs=pl.BlockSpec((tile_b, HD), lambda i: (i, 0)),  # lane-dense (HD=128)
        ),
        compiler_params=pltpu.CompilerParams(dimension_semantics=("parallel",)),
    )(x_flat, bias_flat, w_fused, b_fused)

    # final output projection as a plain XLA matmul (keeps the kernel store lane-dense)
    return agg[:B] @ params["wo"] + params["bo"]


# ---------------- deterministic parameter init ----------------
def init_params(key, input_dim=INPUT_DIM, num_heads=NUM_HEADS):
    D, H = input_dim, num_heads
    kk, kv, kq, ko = jax.random.split(key, 4)

    def lin(k, fan_in, fan_out):
        kw, kb = jax.random.split(k)
        # weights stored pre-transposed as (in, out) so forward is x @ W + b
        w = 0.1 * jax.random.normal(kw, (fan_in, fan_out), jnp.float32)
        b = 0.05 * jax.random.normal(kb, (fan_out,), jnp.float32)
        return w, b

    p = {}
    p["wk"], p["bk"] = lin(kk, D, D * H)       # key_layers
    p["wv"], p["bv"] = lin(kv, D, D * H)       # value_layers
    p["q"] = jax.random.normal(kq, (H, D), jnp.float32)   # queries
    p["wo"], p["bo"] = lin(ko, D * H, D)       # output_layer
    return p


# ---------------- pure-JAX reference (mirrors the torch forward) ----------------
def reference_forward(x, non_padded_mask, p):
    x = x.astype(jnp.float32)
    B, S, D = x.shape
    H = p["q"].shape[0]
    keys = (x @ p["wk"] + p["bk"]).reshape(B, S, H, D)
    vals = (x @ p["wv"] + p["bv"]).reshape(B, S, H, D)
    scores = jnp.einsum("bshd,hd->bsh", keys, p["q"])
    scores = jnp.where(non_padded_mask[..., None], scores, -jnp.inf)
    attn = jax.nn.softmax(scores, axis=1)
    agg = jnp.einsum("bsh,bshd->bhd", attn, vals).reshape(B, H * D)
    return agg @ p["wo"] + p["bo"]


if __name__ == "__main__":
    key = jax.random.PRNGKey(0)
    k_x, k_p = jax.random.split(key)

    B, S = 10, 8                       # B=10 exercises the batch padding path
    x = jax.random.normal(k_x, (B, S, INPUT_DIM), jnp.float32)
    # deterministic mask: each batch element keeps at least one token
    lengths = 1 + (jnp.arange(B) % S)
    non_padded_mask = jnp.arange(S)[None, :] < lengths[:, None]     # (B, S) bool
    params = init_params(k_p)

    out = multihead_attention_forward(x, non_padded_mask, params)
    out = jax.block_until_ready(out)

    ref = reference_forward(x, non_padded_mask, params)
    assert out.shape == (B, INPUT_DIM)
    assert jnp.allclose(out, ref, atol=1e-3, rtol=1e-3), float(jnp.max(jnp.abs(out - ref)))

    # second config: exercises both sequence padding (S=5 -> 8) and batch padding
    B2, S2 = 3, 5
    x2 = jax.random.normal(jax.random.PRNGKey(1), (B2, S2, INPUT_DIM), jnp.float32)
    mask2 = jnp.arange(S2)[None, :] < jnp.array([[5], [3], [1]])
    out2 = jax.block_until_ready(multihead_attention_forward(x2, mask2, params))
    ref2 = reference_forward(x2, mask2, params)
    assert jnp.allclose(out2, ref2, atol=1e-3, rtol=1e-3), float(jnp.max(jnp.abs(out2 - ref2)))

    print("KERNEL_OK")
</pallas_src>

<mosaic_0001>
module attributes {stable_mosaic.version = 11 : i64} {
  func.func @_mha_kernel(%arg0: i32, %arg1: memref<64x32xf32, #tpu.memory_space<vmem>>, %arg2: memref<64x1xf32, #tpu.memory_space<vmem>>, %arg3: memref<32x256xf32, #tpu.memory_space<vmem>>, %arg4: memref<1x256xf32, #tpu.memory_space<vmem>>, %arg5: memref<8x128xf32, #tpu.memory_space<vmem>>) attributes {dimension_semantics = [#tpu.dimension_semantics<parallel>], iteration_bounds = array<i64: 2>, scalar_prefetch = 0 : i64, scratch_operands = 0 : i64, tpu.core_type = #tpu.core_type<tc>, window_params = [{transform_indices = @transform_0, window_bounds = array<i64: 64, 32>}, {transform_indices = @transform_1, window_bounds = array<i64: 64, 1>}, {pipeline_mode = #tpu.pipeline_mode<synchronous>, transform_indices = @transform_2, window_bounds = array<i64: 32, 256>}, {pipeline_mode = #tpu.pipeline_mode<synchronous>, transform_indices = @transform_3, window_bounds = array<i64: 1, 256>}, {transform_indices = @transform_4, window_bounds = array<i64: 8, 128>}]} {
    %c0 = arith.constant 0 : index
    %c0_0 = arith.constant 0 : index
    %0 = vector.load %arg1[%c0, %c0_0] : memref<64x32xf32, #tpu.memory_space<vmem>>, vector<64x32xf32>
    %c0_1 = arith.constant 0 : index
    %c0_2 = arith.constant 0 : index
    %1 = vector.load %arg3[%c0_1, %c0_2] : memref<32x256xf32, #tpu.memory_space<vmem>>, vector<32x256xf32>
    %cst = arith.constant dense<0.000000e+00> : vector<64x256xf32>
    %2 = tpu.matmul %0, %1, %cst {dimension_numbers = #tpu.dot_dimension_numbers<[1], [0], [0], [1], [0, 0, 1, 1], [], []>} : vector<64x32xf32>, vector<32x256xf32>, vector<64x256xf32> -> vector<64x256xf32>
    %c0_3 = arith.constant 0 : index
    %c0_4 = arith.constant 0 : index
    %3 = vector.load %arg4[%c0_3, %c0_4] : memref<1x256xf32, #tpu.memory_space<vmem>>, vector<1x256xf32>
    %4 = vector.broadcast %3 : vector<1x256xf32> to vector<64x256xf32>
    %5 = arith.addf %2, %4 : vector<64x256xf32>
    %6 = vector.extract_strided_slice %5 {offsets = [0, 0], sizes = [64, 128], strides = [1, 1]} : vector<64x256xf32> to vector<64x128xf32>
    %7 = vector.extract_strided_slice %5 {offsets = [0, 128], sizes = [64, 128], strides = [1, 1]} : vector<64x256xf32> to vector<64x128xf32>
    %c0_5 = arith.constant 0 : index
    %c0_6 = arith.constant 0 : index
    %8 = vector.load %arg2[%c0_5, %c0_6] : memref<64x1xf32, #tpu.memory_space<vmem>>, vector<64x1xf32>
    %9 = vector.broadcast %8 : vector<64x1xf32> to vector<64x128xf32>
    %10 = arith.addf %7, %9 : vector<64x128xf32>
    %11 = vector.shape_cast %6 : vector<64x128xf32> to vector<8x8x128xf32>
    %12 = vector.shape_cast %10 : vector<64x128xf32> to vector<8x8x128xf32>
    %cst_7 = arith.constant dense<0xFF800000> : vector<8x128xf32>
    %13 = vector.multi_reduction <maximumf>, %12, %cst_7 [1] : vector<8x8x128xf32> to vector<8x128xf32>
    %14 = vector.shape_cast %13 : vector<8x128xf32> to vector<8x1x128xf32>
    %15 = vector.broadcast %14 : vector<8x1x128xf32> to vector<8x8x128xf32>
    %16 = arith.subf %12, %15 : vector<8x8x128xf32>
    %17 = math.exp %16 : vector<8x8x128xf32>
    %18 = arith.mulf %17, %11 : vector<8x8x128xf32>
    %cst_8 = arith.constant dense<0.000000e+00> : vector<8x128xf32>
    %19 = vector.multi_reduction <add>, %18, %cst_8 [1] : vector<8x8x128xf32> to vector<8x128xf32>
    %cst_9 = arith.constant dense<0.000000e+00> : vector<8x128xf32>
    %20 = vector.multi_reduction <add>, %17, %cst_9 [1] : vector<8x8x128xf32> to vector<8x128xf32>
    %cst_10 = arith.constant 1.000000e-30 : f32
    %21 = vector.broadcast %cst_10 : f32 to vector<8x128xf32>
    %22 = arith.addf %20, %21 : vector<8x128xf32>
    %23 = arith.divf %19, %22 : vector<8x128xf32>
    %c0_11 = arith.constant 0 : index
    %c0_12 = arith.constant 0 : index
    %24 = vector.load %arg5[%c0_11, %c0_12] : memref<8x128xf32, #tpu.memory_space<vmem>>, vector<8x128xf32>
    tpu.vector_store %arg5[%c0_11, %c0_12], %23 {strides = array<i32>} : memref<8x128xf32, #tpu.memory_space<vmem>>, vector<8x128xf32>,
    return
  }
  func.func @transform_0(%arg0: i32) -> (i32, i32) {
    %c0_i32 = arith.constant 0 : i32
    %c0_i32_0 = arith.constant 0 : i32
    return %arg0, %c0_i32 : i32, i32
  }
  func.func @transform_1(%arg0: i32) -> (i32, i32) {
    %c0_i32 = arith.constant 0 : i32
    %c0_i32_0 = arith.constant 0 : i32
    return %arg0, %c0_i32 : i32, i32
  }
  func.func @transform_2(%arg0: i32) -> (i32, i32) {
    %c0_i32 = arith.constant 0 : i32
    %c0_i32_0 = arith.constant 0 : i32
    %c0_i32_1 = arith.constant 0 : i32
    return %c0_i32, %c0_i32_0 : i32, i32
  }
  func.func @transform_3(%arg0: i32) -> (i32, i32) {
    %c0_i32 = arith.constant 0 : i32
    %c0_i32_0 = arith.constant 0 : i32
    %c0_i32_1 = arith.constant 0 : i32
    return %c0_i32, %c0_i32_0 : i32, i32
  }
  func.func @transform_4(%arg0: i32) -> (i32, i32) {
    %c0_i32 = arith.constant 0 : i32
    %c0_i32_0 = arith.constant 0 : i32
    return %arg0, %c0_i32 : i32, i32
  }
}

</mosaic_0001>

<bundles_post_ra>
// kernel: tpu_custom_call.1
= control target key start
LH: loop header
LB: loop body
LE: loop exit
PB: predicated region body
PF: predicated region fallthrough
CT: control target
= control target key end

     0   :  { %9 = vsyncpa [#allocation3], 0  ;;  %s1162_s0 = inlined_call_operand.vmem [shape: f32[128,32], index: 0, kind: input, shape index: {}]   ;;  %s1163_s1 = inlined_call_operand.vmem [shape: f32[128,1], index: 1, kind: input, shape index: {}]   ;;  %s1164_s2 = inlined_call_operand.vmem [shape: f32[32,256], index: 2, kind: input, shape index: {}]   ;;  %s1165_s3 = inlined_call_operand.vmem [shape: f32[1,256], index: 3, kind: input, shape index: {}]   ;;  %s1166_s4 = inlined_call_operand.hbm [shape: f32[16,128], index: 4, kind: output, shape index: {}]  }
   0x1   :  { %11 = vsyncpa [#allocation3 + $0x1], 0  ;;  %s951_s15 = smov 0   ;;  %s953_s16 = smov 0  }
   0x2   :  { %s955_s17 = smov 0   ;;  %s957_s18 = smov 0  }
   0x3 LB: > { %s972_s19 = sadd.s32 4294967295, %s921_s18   ;;  %s751_s20 = sadd.s32 4294967294, %s921_s18   ;;  %s921_s18 = sphi %s957_s18, %s1172_s18   ;;  %s917_s17 = sphi %s955_s17, %s1171_s17   ;;  %s913_s16 = sphi %s953_s16, %s1170_s16   ;;  %s909_s15 = sphi %s951_s15, %s1169_s15  }
   0x4   : > { %s976_s21 = sadd.s32 1, %s921_s18   ;;  %s118_s22 = sadd.s32 1, %s917_s17 }
   0x5   : > { %s115_s23 = ssub.s32 %s921_s18, %s976_s21  ;;  %p128_p0 = scmp.ne.s32.totalorder %s917_s17, %s913_s16 }
   0x6   : > { %p116_p1 = scmp.eq.s32.totalorder %s115_s23, 0  ;;  %p129_p2 = scmp.eq.s32.totalorder %s972_s19, 1 }
   0x7   : > { %p134_p3 = scmp.ne.s32.totalorder %s913_s16, %s909_s15  ;;  %p135_p4 = scmp.eq.s32.totalorder %s751_s20, 1 }
   0x8   : > { %s987_s24 = scalar_select %p116_p1, %s917_s17, %s118_s22  }
   0x9   : > { %p989_p5 = por %p129_p2, %p128_p0  ;;  %p993_p6 = por %p135_p4, %p134_p3 }
   0xa   : > { %p754_p7 = scmp.ge.s32.totalorder %s921_s18, 1  ;;  %p177_p8 = scmp.lt.s32.totalorder %s921_s18, 3 }
   0xc   : > { %p178_p9 = pnand %p754_p7, %p177_p8 }
   0xd   : > { %v229_v0 = vld [vmem:[%s1164_s2 + $0x8] sm:$0xff] (!%p178_p9)  ;;  %v231_v1 = vld [vmem:[%s1164_s2 + $0x18] sm:$0xff] (!%p178_p9)  ;;  %v228_v2 = vld [vmem:[%s1164_s2] sm:$0xff] (!%p178_p9)  ;;  %s756_s7 = sshll.u32 (!%p178_p9), %s972_s19, 3  ;;  %v923_v7 = vmov (!%p178_p9), 0.0   ;;  %v924_v12 = vmov (!%p178_p9), 0   ;;  %v238_v30 = vlaneseq (!%p178_p9) }
   0xe   : > { %181 = sbr.rel (%p178_p9) target bundleno = 327 (0x147), region = 36  ;;  %v772_v3 = vpack.c.bf16 (!%p178_p9), %v231_v1, %v229_v0  ;;  %v230_v4 = vld [vmem:[%s1164_s2 + $0x10] sm:$0xff] (!%p178_p9)  ;;  %v233_v5 = vld [vmem:[%s1164_s2 + $0x28] sm:$0xff] (!%p178_p9)  ;;  %v235_v6 = vld [vmem:[%s1164_s2 + $0x38] sm:$0xff] (!%p178_p9)  ;;  %337 = vmatprep.mubr.f32.mxu0 (!%p178_p9), %v923_v7  ;;  %361 = vmatprep.mubr.f32.mxu1 (!%p178_p9), %v923_v7  ;;  %p209_p10 = scmp.lt.s32.totalorder (!%p178_p9), %s756_s7, 15  ;;  %vm248_vm0 = vcmask (!%p178_p9), 261120  }
   0xf   : > { %v774_v8 = vpack.c.bf16 (!%p178_p9), %v230_v4, %v228_v2  ;;  %v776_v9 = vpack.c.bf16 (!%p178_p9), %v235_v6, %v233_v5  ;;  %v232_v10 = vld [vmem:[%s1164_s2 + $0x20] sm:$0xff] (!%p178_p9)  ;;  %v234_v11 = vld [vmem:[%s1164_s2 + $0x30] sm:$0xff] (!%p178_p9)  ;;  %825 = vset.pattern.permute.xlu0 (!%p178_p9), %v924_v12  ;;  %826 = vset.pattern.permute.xlu1 (!%p178_p9), %v924_v12  ;;  %v1058_v32 = vshrl.u32 (!%p178_p9), %v238_v30, 7  ;;  %vm650_vm1 = vcmask (!%p178_p9), 1041409   ;;  %s205_s10 = sand.u32 (!%p178_p9), 1, %s913_s16   ;;  %s769_s12 = sshll.u32 (!%p178_p9), %s972_s19, 7 }
  0x10   : > { %773 = vmatprep.subr.bf16.mxu0 (!%p178_p9), %v772_v3  ;;  %780 = vmatprep.subr.bf16.mxu1 (!%p178_p9), %v772_v3  ;;  %v778_v13 = vpack.c.bf16 (!%p178_p9), %v234_v11, %v232_v10  ;;  %v1064_v36 = vld [vmem:[%s1165_s3] sm:$0x3] (!%p178_p9)  ;;  %vm652_vm2 = vcmask (!%p178_p9), 1042434   ;;  %vm654_vm3 = vcmask (!%p178_p9), 1043459   ;;  %s1110_s11 = sshll.u32 (!%p178_p9), %s205_s10, 3  ;;  %vm656_vm4 = vcmask (!%p178_p9), 1044484   ;;  %s1118_s23 = scalar_lea.hbm (!%p178_p9), %s1166_s4, %s769_s12 }
  0x11   : > { %775 = vmatpush1.bf16.msra.mxu0 (!%p178_p9), %v774_v8  ;;  %782 = vmatpush1.bf16.msra.mxu1 (!%p178_p9), %v774_v8  ;;  %v244_v35 = vsub.s32 (!%p178_p9), 1, %v1058_v32  ;;  %vm658_vm5 = vcmask (!%p178_p9), 1045509   ;;  %vm660_vm6 = vcmask (!%p178_p9), 1046534   ;;  %s207_s13 = scalar_lea.vmem (!%p178_p9), [#allocation2], %s1110_s11  ;;  %vm662_vm7 = vcmask (!%p178_p9), 1047559   ;;  %s667_s19 = scalar_lea.sflag (!%p178_p9), [#allocation3], %s205_s10 }
  0x12   : > { %777 = vmatprep.subr.bf16.mxu0 (!%p178_p9), %v776_v9  ;;  %781 = vmatprep.subr.bf16.mxu1 (!%p178_p9), %v776_v9  ;;  %s680_s14 = sshll.u32 (!%p178_p9), %s207_s13, 4  ;;  %s925_s28 = smov (!%p178_p9), [#allocation2]   ;;  %s1120_s14 = int_to_ptr.vmem [resolvable:$true] %s680_s14 }
  0x13   : > { %v245_v37 = vrot.slane (!%p178_p9), %v1064_v36, %v244_v35  ;;  %s863_s29 = sshll.u32 (!%p178_p9), %s925_s28, 4  ;;  %s864_s29 = int_to_ptr.vmem [resolvable:$false] %s863_s29 }
  0x14   : > { %p866_p0 = scmp.lt.s32.totalorder (!%p178_p9), %s1120_s14, %s864_s29 }
  0x15   : > { %s1174_s7 = smov (!%p209_p10, %s756_s7), 15  ;;  %779 = vmatpush1.bf16.msra.mxu0 %v778_v13  ;;  %783 = vmatpush1.bf16.msra.mxu1 %v778_v13 }
  0x16   : > { %s757_s27 = sshll.u32 %s1174_s7, 3 }
  0x17   : > { %s1027_s30 = scalar_lea.vmem %s1162_s0, %s757_s27  ;;  %s1032_s8 = scalar_lea.vmem %s1163_s1, %s757_s27 }
  0x18   : > { %v220_v14 = vld [vmem:[%s1027_s30] sm:$0xff]  ;;  %v388_v17 = vld [vmem:[%s1032_s8 + $0x10] sm:$0xff]  ;;  %v387_v18 = vld [vmem:[%s1032_s8 + $0x8] sm:$0xff]  ;;  %s859_s27 = scalar_lea.vmem %s1120_s14, 128 }
  0x19   : > { %v224_v15 = vld [vmem:[%s1027_s30 + $0x20] sm:$0xff]  ;;  %760 = vmatmul.mubr.msk.f32.vlgmr.msra.gmra.mrb[0].mxu0 %vm248_vm0, %v220_v14  ;;  %v221_v19 = vld [vmem:[%s1027_s30 + $0x8] sm:$0xff]  ;;  %406 = vperm.xlu1 %826, %v388_v17   ;;  %v389_v21 = vld [vmem:[%s1032_s8 + $0x18] sm:$0xff]  ;;  %p860_p11 = scmp.ne.s32.totalorder %s1120_s14, %s859_s27 }
  0x1a   : > { %v386_v16 = vld [vmem:[%s1032_s8] sm:$0xff]  ;;  %764 = vmatmul.mubr.msk.f32.vlgmr.msra.gmra.mrb[0].mxu1 %vm248_vm0, %v224_v15  ;;  %343 = vmatprep.mubr.f32.mxu0 %v923_v7  ;;  %v225_v20 = vld [vmem:[%s1027_s30 + $0x28] sm:$0xff]  ;;  %v222_v23 = vld [vmem:[%s1027_s30 + $0x10] sm:$0xff] }
  0x1b   : > { %396 = vperm.xlu0 %825, %v386_v16   ;;  %367 = vmatprep.mubr.f32.mxu1 %v923_v7  ;;  %v390_v22 = vld [vmem:[%s1032_s8 + $0x20] sm:$0xff]  ;;  %v226_v24 = vld [vmem:[%s1027_s30 + $0x30] sm:$0xff]  ;;  %v391_v25 = vld [vmem:[%s1032_s8 + $0x28] sm:$0xff]  ;;  %p861_p12 = pnand %p860_p11, %p989_p5 }
  0x1c   : > { %v392_v26 = vld [vmem:[%s1032_s8 + $0x30] sm:$0xff]  ;;  %v223_v27 = vld [vmem:[%s1027_s30 + $0x18] sm:$0xff] }
  0x1d   : > { %761 = vmatmul.mubr.msk.f32.gmra.mrb[2].mxu0 %vm248_vm0, %v221_v19  ;;  %411 = vperm.xlu1 %826, %v389_v21   ;;  %v227_v28 = vld [vmem:[%s1027_s30 + $0x38] sm:$0xff]  ;;  %p862_p13 = pneg %p861_p12  ;;  %s865_s30 = scalar_lea.vmem %s864_s29, 256 }
  0x1e   : > { %765 = vmatmul.mubr.msk.f32.gmra.mrb[2].mxu1 %vm248_vm0, %v225_v20  ;;  %349 = vmatprep.mubr.f32.mxu0 %v923_v7  ;;  %v393_v29 = vld [vmem:[%s1032_s8 + $0x38] sm:$0xff]  ;;  %p867_p1 = scmp.lt.s32.totalorder %s865_s30, %s859_s27 }
  0x1f   : > { %401 = vperm.xlu0 %825, %v387_v18   ;;  %373 = vmatprep.mubr.f32.mxu1 %v923_v7 }
  0x20   : > { %p868_p2 = por %p867_p1, %p866_p0 }
  0x21   : > { %762 = vmatmul.mubr.msk.f32.gmra.mrb[4].mxu0 %vm248_vm0, %v222_v23  ;;  %421 = vperm.xlu1 %826, %v391_v25  }
  0x22   : > { %766 = vmatmul.mubr.msk.f32.gmra.mrb[4].mxu1 %vm248_vm0, %v226_v24  ;;  %355 = vmatprep.mubr.f32.mxu0 %v923_v7  ;;  %p869_p3 = pnand %p868_p2, %p862_p13 }
  0x23   : > { %416 = vperm.xlu0 %825, %v390_v22   ;;  %379 = vmatprep.mubr.f32.mxu1 %v923_v7 }
  0x25   : > { %763 = vmatmul.mubr.msk.f32.gmra.mrb[6].mxu0 %vm248_vm0, %v223_v27  ;;  %431 = vperm.xlu1 %826, %v393_v29  }
  0x26   : > { %767 = vmatmul.mubr.msk.f32.gmra.mrb[6].mxu1 %vm248_vm0, %v227_v28 }
  0x27   : > { %426 = vperm.xlu0 %825, %v392_v26  }
  0x98   : > { %v407_v33 = vpop.permute.xlu1 %406 }
  0x9a   : > { %v397_v31 = vpop.permute.xlu0 %396 }
  0x9c   : > { %v412_v38 = vpop.permute.xlu1 %411 }
  0x9e   : > { %v402_v34 = vpop.permute.xlu0 %401 }
  0xa0   : > { %v422_v56 = vpop.permute.xlu1 %421 }
  0xa2   : > { %v417_v39 = vpop.permute.xlu0 %416 }
  0xa4   : > { %v432_v30 = vpop.permute.xlu1 %431 }
  0xa6   : > { %v427_v5 = vpop.permute.xlu0 %426 }
  0xec   : > { %v1067_v40 = vpop.f32.mrb[0].mxu0 }
  0xed   : > { %v1069_v41 = vpop.f32.mrb[0].mxu1  ;;  %v341_v42 = vpop.f32.mrb[1].mxu0 }
  0xee   : > { %v365_v43 = vpop.f32.mrb[1].mxu1  ;;  %v342_v44 = vadd.f32 %v341_v42, %v245_v37 }
  0xef   : > { %v366_v45 = vadd.f32 %v365_v43, %v245_v37 }
  0xf0   : > { %v434_v46 = vadd.f32 %v397_v31, %v342_v44  ;;  %v1071_v48 = vpop.f32.mrb[2].mxu0 }
  0xf1   : > { %v438_v47 = vadd.f32 %v417_v39, %v366_v45  ;;  %v1073_v49 = vpop.f32.mrb[2].mxu1  ;;  %v347_v50 = vpop.f32.mrb[3].mxu0 }
  0xf2   : > { %v371_v51 = vpop.f32.mrb[3].mxu1  ;;  %v442_v52 = vrot.slane %v434_v46, 4  ;;  %v348_v54 = vadd.f32 %v347_v50, %v245_v37 }
  0xf3   : > { %v466_v53 = vrot.slane %v438_v47, 4  ;;  %v372_v55 = vadd.f32 %v371_v51, %v245_v37 }
  0xf4   : > { %v443_v57 = vmax.f32 %v434_v46, %v442_v52  ;;  %v1075_v59 = vadd.f32 %v402_v34, %v348_v54  ;;  %v1079_v61 = vpop.f32.mrb[4].mxu0 }
  0xf5   : > { %v467_v58 = vmax.f32 %v438_v47, %v466_v53  ;;  %v1077_v60 = vadd.f32 %v422_v56, %v372_v55  ;;  %v1081_v62 = vpop.f32.mrb[4].mxu1  ;;  %v353_v63 = vpop.f32.mrb[5].mxu0 }
  0xf6   : > { %v377_v0 = vpop.f32.mrb[5].mxu1  ;;  %v444_v1 = vrot.slane %v443_v57, 2  ;;  %v448_v3 = vrot.slane %v1075_v59, 4  ;;  %v354_v6 = vadd.f32 %v353_v63, %v245_v37 }
  0xf7   : > { %v468_v2 = vrot.slane %v467_v58, 2  ;;  %v472_v4 = vrot.slane %v1077_v60, 4  ;;  %v378_v7 = vadd.f32 %v377_v0, %v245_v37  ;;  %v240_v0 = vsub.s32 0, %v1058_v32 }
  0xf8   : > { %v445_v8 = vmax.f32 %v443_v57, %v444_v1  ;;  %v449_v10 = vmax.f32 %v1075_v59, %v448_v3  ;;  %v1087_v12 = vpop.f32.mrb[6].mxu0  ;;  %v436_v14 = vadd.f32 %v407_v33, %v354_v6 }
  0xf9   : > { %v469_v9 = vmax.f32 %v467_v58, %v468_v2  ;;  %v473_v11 = vmax.f32 %v1077_v60, %v472_v4  ;;  %v1089_v13 = vpop.f32.mrb[6].mxu1  ;;  %v440_v15 = vadd.f32 %v427_v5, %v378_v7  ;;  %v359_v16 = vpop.f32.mrb[7].mxu0 }
  0xfa   : > { %v383_v17 = vpop.f32.mrb[7].mxu1  ;;  %v446_v18 = vrot.slane %v445_v8, 1  ;;  %v450_v20 = vrot.slane %v449_v10, 2  ;;  %v454_v22 = vrot.slane %v436_v14, 4  ;;  %v360_v24 = vadd.f32 %v359_v16, %v245_v37 }
  0xfb   : > { %v470_v19 = vrot.slane %v469_v9, 1  ;;  %v474_v21 = vrot.slane %v473_v11, 2  ;;  %v478_v23 = vrot.slane %v440_v15, 4  ;;  %v384_v25 = vadd.f32 %v383_v17, %v245_v37 }
  0xfc   : > { %v447_v26 = vmax.f32 %v445_v8, %v446_v18  ;;  %v451_v28 = vmax.f32 %v449_v10, %v450_v20  ;;  %v455_v31 = vmax.f32 %v436_v14, %v454_v22  ;;  %v437_v35 = vadd.f32 %v412_v38, %v360_v24 }
  0xfd   : > { %v471_v27 = vmax.f32 %v469_v9, %v470_v19  ;;  %v475_v29 = vmax.f32 %v473_v11, %v474_v21  ;;  %v479_v34 = vmax.f32 %v440_v15, %v478_v23  ;;  %v441_v33 = vadd.f32 %v432_v30, %v384_v25 }
  0xfe   : > { %v490_v39 = vsub.f32 %v434_v46, %v447_v26  ;;  %v452_v43 = vrot.slane %v451_v28, 1  ;;  %v456_v45 = vrot.slane %v455_v31, 2  ;;  %v460_v51 = vrot.slane %v437_v35, 4 }
  0xff   : > { %v494_v42 = vsub.f32 %v438_v47, %v471_v27  ;;  %v476_v44 = vrot.slane %v475_v29, 1  ;;  %v480_v50 = vrot.slane %v479_v34, 2  ;;  %v484_v52 = vrot.slane %v441_v33, 4 }
 0x100   : > { %v498_v53 = vmul.f32 1.442695, %v490_v39  ;;  %v453_v37 = vmax.f32 %v451_v28, %v452_v43  ;;  %v457_v56 = vmax.f32 %v455_v31, %v456_v45  ;;  %v461_v58 = vmax.f32 %v437_v35, %v460_v51 }
 0x101   : > { %v506_v54 = vmul.f32 1.442695, %v494_v42  ;;  %v477_v55 = vmax.f32 %v475_v29, %v476_v44  ;;  %v481_v57 = vmax.f32 %v479_v34, %v480_v50  ;;  %v485_v63 = vmax.f32 %v441_v33, %v484_v52 }
 0x102   : > { %827 = vpow2.f32 %v498_v53  ;;  %v491_v38 = vsub.f32 %v1075_v59, %v453_v37  ;;  %v458_v47 = vrot.slane %v457_v56, 1  ;;  %v462_v2 = vrot.slane %v461_v58, 2 }
 0x103   : > { %v495_v46 = vsub.f32 %v1077_v60, %v477_v55  ;;  %829 = vpow2.f32 %v506_v54  ;;  %v482_v1 = vrot.slane %v481_v57, 1  ;;  %v486_v5 = vrot.slane %v485_v63, 2 }
 0x104   : > { %v500_v3 = vmul.f32 1.442695, %v491_v38  ;;  %v459_v6 = vmax.f32 %v457_v56, %v458_v47  ;;  %v463_v8 = vmax.f32 %v461_v58, %v462_v2  ;;  %v241_v9 = vrot.slane %v1064_v36, %v240_v0 }
 0x105   : > { %v508_v4 = vmul.f32 1.442695, %v495_v46  ;;  %v483_v7 = vmax.f32 %v481_v57, %v482_v1  ;;  %v487_v10 = vmax.f32 %v485_v63, %v486_v5 }
 0x106   : > { %831 = vpow2.f32 %v500_v3  ;;  %v492_v32 = vsub.f32 %v436_v14, %v459_v6  ;;  %v464_v59 = vrot.slane %v463_v8, 1  ;;  %v340_v20 = vadd.f32 %v1067_v40, %v241_v9 }
 0x107   : > { %833 = vpow2.f32 %v508_v4  ;;  %v496_v11 = vsub.f32 %v440_v15, %v483_v7  ;;  %v488_v16 = vrot.slane %v487_v10, 1  ;;  %v364_v23 = vadd.f32 %v1069_v41, %v241_v9 }
 0x108   : > { %v502_v60 = vmul.f32 1.442695, %v492_v32  ;;  %v465_v18 = vmax.f32 %v463_v8, %v464_v59  ;;  %v346_v28 = vadd.f32 %v1071_v48, %v241_v9  ;;  %v370_v40 = vadd.f32 %v1073_v49, %v241_v9 }
 0x109   : > { %v510_v17 = vmul.f32 1.442695, %v496_v11  ;;  %v489_v19 = vmax.f32 %v487_v10, %v488_v16  ;;  %v352_v43 = vadd.f32 %v1079_v61, %v241_v9  ;;  %v376_v50 = vadd.f32 %v1081_v62, %v241_v9 }
 0x10a   : > { %835 = vpow2.f32 %v502_v60  ;;  %v493_v21 = vsub.f32 %v437_v35, %v465_v18  ;;  %v358_v49 = vadd.f32 %v1087_v12, %v241_v9  ;;  %v382_v56 = vadd.f32 %v1089_v13, %v241_v9 }
 0x10b   : > { %837 = vpow2.f32 %v510_v17  ;;  %v497_v36 = vsub.f32 %v441_v33, %v489_v19 }
 0x10c   : > { %v828_v22 = vpop.eup %827  ;;  %v504_v26 = vmul.f32 1.442695, %v493_v21 }
 0x10d   : > { %v830_v24 = vpop.eup %829  ;;  %v570_v25 = vrot.slane %v828_v22, 4  ;;  %v514_v14 = vmul.f32 %v828_v22, %v340_v20  ;;  %v512_v15 = vmul.f32 1.442695, %v497_v36 }
 0x10e   : > { %v518_v27 = vmul.f32 %v830_v24, %v364_v23  ;;  %839 = vpow2.f32 %v504_v26  ;;  %v594_v34 = vrot.slane %v830_v24, 4 }
 0x10f   : > { %v571_v30 = vadd.f32 %v828_v22, %v570_v25  ;;  %841 = vpow2.f32 %v512_v15  ;;  %v522_v57 = vrot.slane %v514_v14, 4 }
 0x110   : > { %v832_v29 = vpop.eup %831  ;;  %v595_v45 = vadd.f32 %v830_v24, %v594_v34  ;;  %v546_v61 = vrot.slane %v518_v27, 4 }
 0x111   : > { %v834_v31 = vpop.eup %833  ;;  %v576_v35 = vrot.slane %v832_v29, 4  ;;  %v515_v41 = vmul.f32 %v832_v29, %v346_v28  ;;  %v572_v42 = vrot.slane %v571_v30, 2  ;;  %v523_v12 = vadd.f32 %v522_v57, %v514_v14 }
 0x112   : > { %v519_v39 = vmul.f32 %v834_v31, %v370_v40  ;;  %v596_v0 = vrot.slane %v595_v45, 2  ;;  %v600_v38 = vrot.slane %v834_v31, 4  ;;  %v547_v7 = vadd.f32 %v546_v61, %v518_v27 }
 0x113   : > { %v577_v33 = vadd.f32 %v832_v29, %v576_v35  ;;  %v573_v37 = vadd.f32 %v572_v42, %v571_v30  ;;  %v528_v63 = vrot.slane %v515_v41, 4  ;;  %v524_v60 = vrot.slane %v523_v12, 2 }
 0x114   : > { %v836_v44 = vpop.eup %835  ;;  %v597_v8 = vadd.f32 %v596_v0, %v595_v45  ;;  %v601_v10 = vadd.f32 %v834_v31, %v600_v38  ;;  %v552_v9 = vrot.slane %v519_v39, 4  ;;  %v548_v36 = vrot.slane %v547_v7, 2 }
 0x115   : > { %v838_v48 = vpop.eup %837  ;;  %v578_v51 = vrot.slane %v577_v33, 2  ;;  %v582_v52 = vrot.slane %v836_v44, 4  ;;  %v516_v53 = vmul.f32 %v836_v44, %v352_v43  ;;  %v574_v5 = vrot.slane %v573_v37, 1 }
 0x116   : > { %v1102_v54 = vmul.f32 %v838_v48, %v376_v50  ;;  %v529_v13 = vadd.f32 %v528_v63, %v515_v41  ;;  %v598_v21 = vrot.slane %v597_v8, 1  ;;  %v602_v22 = vrot.slane %v601_v10, 2 }
 0x117   : > { %v583_v55 = vadd.f32 %v836_v44, %v582_v52  ;;  %v579_v62 = vadd.f32 %v578_v51, %v577_v33  ;;  %v534_v6 = vrot.slane %v516_v53, 4  ;;  %v575_v17 = vadd.f32 %v574_v5, %v573_v37 }
 0x118   : > { %v840_v58 = vpop.eup %839  ;;  %v530_v23 = vrot.slane %v529_v13, 2  ;;  %v553_v24 = vadd.f32 %v552_v9, %v519_v39  ;;  %v603_v27 = vadd.f32 %v602_v22, %v601_v10  ;;  %v558_v28 = vrot.slane %v1102_v54, 4 }
 0x119   : > { %v842_v46 = vpop.eup %841  ;;  %v584_v47 = vrot.slane %v583_v55, 2  ;;  %v588_v1 = vrot.slane %v840_v58, 4  ;;  %v517_v2 = vmul.f32 %v840_v58, %v358_v49  ;;  %v580_v32 = vrot.slane %v579_v62, 1 }
 0x11a   : > { %v521_v3 = vmul.f32 %v842_v46, %v382_v56  ;;  %v535_v19 = vadd.f32 %v534_v6, %v516_v53  ;;  %v599_v29 = vadd.f32 %v598_v21, %v597_v8  ;;  %v606_v30 = vrot.slane %v838_v48, 4 }
 0x11b   : > { %v589_v4 = vadd.f32 %v840_v58, %v588_v1  ;;  %v585_v11 = vadd.f32 %v584_v47, %v583_v55  ;;  %v540_v59 = vrot.slane %v517_v2, 4  ;;  %v581_v25 = vadd.f32 %v580_v32, %v579_v62 }
 0x11c   : > { %v612_v40 = vrot.slane %v842_v46, 4  ;;  %v536_v31 = vrot.slane %v535_v19, 2  ;;  %v604_v35 = vrot.slane %v603_v27, 1  ;;  %v618_v41 = vadd.f32 1e-30, %v575_v17 }
 0x11d   : > { %v590_v16 = vrot.slane %v589_v4, 2  ;;  %v586_v18 = vrot.slane %v585_v11, 1  ;;  %v541_v26 = vadd.f32 %v540_v59, %v517_v2  ;;  %v564_v33 = vrot.slane %v521_v3, 4 }
 0x11e   : > { %v607_v42 = vadd.f32 %v838_v48, %v606_v30  ;;  %v613_v43 = vadd.f32 %v842_v46, %v612_v40  ;;  %v619_v44 = vadd.f32 1e-30, %v581_v25  ;;  %v605_v39 = vadd.f32 %v604_v35, %v603_v27 }
 0x11f   : > { %v591_v20 = vadd.f32 %v590_v16, %v589_v4  ;;  %v587_v14 = vadd.f32 %v586_v18, %v585_v11  ;;  %v542_v45 = vrot.slane %v541_v26, 2  ;;  %v622_v49 = vadd.f32 1e-30, %v599_v29 }
 0x120   : > { %v608_v52 = vrot.slane %v607_v42, 2  ;;  %v614_v53 = vrot.slane %v613_v43, 2  ;;  %843 = vrcp.f32 %v618_v41  ;;  %v525_v37 = vadd.f32 %v524_v60, %v523_v12 }
 0x121   : > { %v592_v15 = vrot.slane %v591_v20, 1  ;;  %v620_v50 = vadd.f32 1e-30, %v587_v14  ;;  %v554_v55 = vrot.slane %v553_v24, 2  ;;  %v623_v56 = vadd.f32 1e-30, %v605_v39 }
 0x122   : > { %845 = vrcp.f32 %v619_v44  ;;  %v531_v57 = vadd.f32 %v530_v23, %v529_v13  ;;  %v609_v58 = vadd.f32 %v608_v52, %v607_v42  ;;  %v615_v63 = vadd.f32 %v614_v53, %v613_v43 }
 0x123   : > { %v593_v34 = vadd.f32 %v592_v15, %v591_v20  ;;  %847 = vrcp.f32 %v620_v50  ;;  %v537_v61 = vadd.f32 %v536_v31, %v535_v19  ;;  %v559_v48 = vadd.f32 %v558_v28, %v1102_v54 }
 0x124   : > { %v565_v0 = vadd.f32 %v564_v33, %v521_v3  ;;  %v543_v38 = vadd.f32 %v542_v45, %v541_v26  ;;  %v610_v46 = vrot.slane %v609_v58, 1  ;;  %v616_v62 = vrot.slane %v615_v63, 1 }
 0x125   : > { %v621_v51 = vadd.f32 1e-30, %v593_v34  ;;  %v526_v47 = vrot.slane %v525_v37, 1  ;;  %v549_v1 = vadd.f32 %v548_v36, %v547_v7  ;;  %v532_v2 = vrot.slane %v531_v57, 1 }
 0x126   : > { %v555_v4 = vadd.f32 %v554_v55, %v553_v24  ;;  %v611_v12 = vadd.f32 %v610_v46, %v609_v58  ;;  %v617_v5 = vadd.f32 %v616_v62, %v615_v63  ;;  %v538_v6 = vrot.slane %v537_v61, 1 }
 0x127   : > { %849 = vrcp.f32 %v621_v51  ;;  %v560_v8 = vrot.slane %v559_v48, 2  ;;  %v544_v10 = vrot.slane %v543_v38, 1  ;;  %v566_v13 = vrot.slane %v565_v0, 2 }
 0x128   : > { %851 = vrcp.f32 %v622_v49  ;;  %v624_v9 = vadd.f32 1e-30, %v611_v12  ;;  %v625_v54 = vadd.f32 1e-30, %v617_v5  ;;  %v527_v3 = vadd.f32 %v526_v47, %v525_v37 }
 0x129   : > { %853 = vrcp.f32 %v623_v56  ;;  %v550_v32 = vrot.slane %v549_v1, 1  ;;  %v533_v59 = vadd.f32 %v532_v2, %v531_v57  ;;  %v556_v16 = vrot.slane %v555_v4, 1 }
 0x12a   : > { %v844_v11 = vpop.eup %843  ;;  %855 = vrcp.f32 %v624_v9  ;;  %v539_v60 = vadd.f32 %v538_v6, %v537_v61  ;;  %v561_v17 = vadd.f32 %v560_v8, %v559_v48  ;;  %v545_v20 = vadd.f32 %v544_v10, %v543_v38 }
 0x12b   : > { %v627_v18 = vmul.f32 %v844_v11, %v527_v3  ;;  %857 = vrcp.f32 %v625_v54  ;;  %v567_v21 = vadd.f32 %v566_v13, %v565_v0  ;;  %v551_v36 = vadd.f32 %v550_v32, %v549_v1 }
 0x12c   : > { %v846_v7 = vpop.eup %845  ;;  %v557_v26 = vadd.f32 %v556_v16, %v555_v4  ;;  %v562_v28 = vrot.slane %v561_v17, 1 }
 0x12d   : > { %v848_v19 = vpop.eup %847  ;;  %v629_v22 = vmul.f32 %v846_v7, %v533_v59  ;;  %v568_v40 = vrot.slane %v567_v21, 1 }
 0x12e   : > { %v631_v24 = vmul.f32 %v848_v19, %v539_v60  ;;  %v563_v33 = vadd.f32 %v562_v28, %v561_v17 }
 0x12f   : > { %v651_v15 = vsel %vm650_vm1, %v629_v22, %v627_v18  ;;  %v569_v43 = vadd.f32 %v568_v40, %v567_v21 }
 0x130   : > { %v653_v30 = vsel %vm652_vm2, %v631_v24, %v651_v15 }
 0x131   : > { %v850_v23 = vpop.eup %849 }
 0x132   : > { %v852_v25 = vpop.eup %851  ;;  %v633_v14 = vmul.f32 %v850_v23, %v545_v20 }
 0x133   : > { %v854_v27 = vpop.eup %853  ;;  %v635_v29 = vmul.f32 %v852_v25, %v551_v36 }
 0x134   : > { %v637_v31 = vmul.f32 %v854_v27, %v557_v26  ;;  %v655_v34 = vsel %vm654_vm3, %v633_v14, %v653_v30  ;;  %v856_v42 = vpop.eup %855 }
 0x135   : > { %v657_v35 = vsel %vm656_vm4, %v635_v29, %v655_v34  ;;  %v858_v44 = vpop.eup %857  ;;  %v639_v45 = vmul.f32 %v856_v42, %v563_v33 }
 0x136   : > { %v659_v41 = vsel %vm658_vm5, %v637_v31, %v657_v35  ;;  %v641_v39 = vmul.f32 %v858_v44, %v569_v43 }
 0x137   : > { %v661_v50 = vsel %vm660_vm6, %v639_v45, %v659_v41 }
 0x138   : > { %v663_v51 = vsel %vm662_vm7, %v641_v39, %v661_v50 }
 0x139   : > { %665 = vst [vmem:[%s207_s13] sm:$0xff] %v663_v51 }
 0x13a   : > { %872 = shalt.err (!%p869_p3)
}
 0x13b   : > { %s873_s5 = scalar_lea.hbm %s1118_s23, 128  ;;  %s877_s7 = scalar_lea.hbm %s1166_s4, 256 }
 0x13c   : > { %p874_p4 = scmp.ne.s32.totalorder %s1118_s23, %s873_s5  ;;  %p878_p9 = scmp.lt.u32.totalorder %s1118_s23, %s1166_s4 }
 0x13d   : > { %p879_p10 = scmp.lt.u32.totalorder %s877_s7, %s873_s5  ;;  %p881_p12 = scmp.lt.u32.totalorder %s873_s5, %s1118_s23 }
 0x13e   : > { %p875_p7 = pnand %p874_p4, %p989_p5 }
 0x13f   : > { %p880_p11 = por %p879_p10, %p878_p9 }
 0x140   : > { %p876_p8 = pneg %p875_p7 }
 0x141   : > { %p882_p13 = por %p881_p12, %p880_p11 }
 0x143   : > { %p883_p0 = pnand %p882_p13, %p876_p8 }
 0x145   : > { %886 = shalt.err (!%p883_p0)
}
 0x146   : > { %784 = dma.vmem_to_hbm [thread:$0]  (%p989_p5), %s1120_s14, 128, %s1118_s23, %s667_s19  }
 0x147 PF: > { %p790_p1 = scmp.ge.s32.totalorder %s921_s18, 2  ;;  %s692_s11 = sand.u32 1, %s909_s15  }
 0x148   : > { %s693_s12 = scalar_lea.sflag [#allocation3], %s692_s11 }
 0x149   : > { %p787_p2 = pnand %p790_p1, %p993_p6 }
 0x14b   : > { %904 = dma.done.wait (!%p787_p2), %s693_s12, 128  }
 0x14c   : > { %906 = vsyncadd (!%p787_p2), %s693_s12, 4294967168  ;;  %p14_p3 = scmp.ge.s32.totalorder %s976_s21, 4   ;;  %s1169_s15 = smov %s913_s16 }
 0x14d   : > { %s1170_s16 = smov %s917_s17  ;;  %s1171_s17 = smov %s987_s24 }
 0x14e   : > { %s1172_s18 = smov %s976_s21  ;;  %16 = sbr.rel (!%p14_p3) target bundleno = 3 (0x3), region = 74 }
 0x155   :  { %698 = vsyncpa [#allocation3], 1 }
 0x156   :  { %700 = vsyncpa [#allocation3 + $0x1], 1 }

</bundles_post_ra>
